<compile_context>
chip_gen: v7x
topology: tpu7x:2x2x1
jax: 0.10.0
libtpu: 0.0.40
codegen_flags: <defaults>
</compile_context>

<pallas_src>
import functools

import jax
import jax.numpy as jnp
from jax.experimental import pallas as pl
from jax.experimental.pallas import tpu as pltpu


def _ceil_to(n, m):
    return ((n + m - 1) // m) * m


def _pad2(a, rows, cols):
    pr, pc = rows - a.shape[0], cols - a.shape[1]
    if pr or pc:
        a = jnp.pad(a, ((0, pr), (0, pc)))
    return a


def _hgnn_conv_kernel(g_ref, x_ref, w_ref, b_ref, *rest, apply_dropout):
    """One HGNN_conv layer: out_tile = relu( sum_k G[i,k] @ (x[k] @ W + b) ) [* drop]."""
    if apply_dropout:
        drop_ref, out_ref, acc_ref = rest
    else:
        out_ref, acc_ref = rest

    k = pl.program_id(1)

    @pl.when(k == 0)
    def _():
        acc_ref[...] = jnp.zeros_like(acc_ref)

    # t_k = x[k_blk] @ W + b  -- bias is row-constant, so folding it into every
    # K-block is exactly G @ (xW + b) after the reduction.
    t = jnp.dot(x_ref[...], w_ref[...], preferred_element_type=jnp.float32)
    t = t + b_ref[...]                                   # b is [1, H], broadcasts
    # G-side propagation for this K block; keep MXU operands in bf16, acc in f32.
    acc_ref[...] += jnp.dot(g_ref[...], t.astype(g_ref.dtype),
                            preferred_element_type=jnp.float32)

    @pl.when(k == pl.num_programs(1) - 1)
    def _():
        h = jnp.maximum(acc_ref[...], 0.0)
        if apply_dropout:
            h = h * drop_ref[...]
        out_ref[...] = h.astype(out_ref.dtype)


def _hgnn_conv_layer(G, feat, W, b, drop_scale, out_dtype, tile):
    """relu(G @ (feat @ W + b)) [* drop_scale], all inputs already padded/aligned."""
    Np = G.shape[0]
    F = feat.shape[1]
    H = W.shape[1]
    grid = (Np // tile, Np // tile)

    apply_dropout = drop_scale is not None
    kernel = functools.partial(_hgnn_conv_kernel, apply_dropout=apply_dropout)

    in_specs = [
        pl.BlockSpec((tile, tile), lambda i, k: (i, k)),   # G row/col tile
        pl.BlockSpec((tile, F), lambda i, k: (k, 0)),      # feature rows for K block
        pl.BlockSpec((F, H), lambda i, k: (0, 0)),         # W (VMEM resident)
        pl.BlockSpec((1, H), lambda i, k: (0, 0)),         # bias (VMEM resident)
    ]
    args = [G, feat, W, b.reshape(1, -1)]
    if apply_dropout:
        in_specs.append(pl.BlockSpec((tile, H), lambda i, k: (i, 0)))
        args.append(drop_scale)

    return pl.pallas_call(
        kernel,
        out_shape=jax.ShapeDtypeStruct((Np, H), out_dtype),
        grid=grid,
        in_specs=in_specs,
        out_specs=pl.BlockSpec((tile, H), lambda i, k: (i, 0)),
        scratch_shapes=[pltpu.VMEM((tile, H), jnp.float32)],
        compiler_params=pltpu.CompilerParams(
            dimension_semantics=("parallel", "arbitrary"),
            vmem_limit_bytes=32 * 1024 * 1024,
        ),
    )(*args)


def hgnn_embedding_forward(x, G, w1, b1, w2, b2, *, dropout_p=0.5,
                           training=True, seed=0, tile=128):
    N, in_ch = x.shape
    n_hid = w1.shape[1]

    # Pad to lane/tile-aligned shapes (zeros are inert through matmul/relu/dropout).
    Np = _ceil_to(N, tile)
    Cp = _ceil_to(in_ch, 128)
    Hp = _ceil_to(n_hid, 128)

    xp = _pad2(x, Np, Cp).astype(jnp.bfloat16)
    Gp = _pad2(G, Np, Np).astype(jnp.bfloat16)
    w1p = _pad2(w1, Cp, Hp).astype(jnp.bfloat16)
    w2p = _pad2(w2, Hp, Hp).astype(jnp.bfloat16)
    b1p = jnp.pad(b1, (0, Hp - n_hid)).astype(jnp.float32)
    b2p = jnp.pad(b2, (0, Hp - n_hid)).astype(jnp.float32)

    # Host-side dropout mask (inverted scaling), skipped entirely when inactive.
    if training and dropout_p > 0.0:
        if dropout_p >= 1.0:
            drop_scale = jnp.zeros((Np, Hp), jnp.float32)
        else:
            keep = jax.random.bernoulli(jax.random.PRNGKey(seed),
                                        1.0 - dropout_p, (Np, Hp))
            drop_scale = keep.astype(jnp.float32) * (1.0 / (1.0 - dropout_p))
    else:
        drop_scale = None

    # Layer 1: relu(G @ (x @ W1 + b1)) with fused dropout; h stays bf16 for the
    # second layer's MXU dots.
    h = _hgnn_conv_layer(Gp, xp, w1p, b1p, drop_scale, jnp.bfloat16, tile)
    # Layer 2: relu(G @ (h @ W2 + b2)), final output in f32.
    y = _hgnn_conv_layer(Gp, h, w2p, b2p, None, jnp.float32, tile)

    return y[:N, :n_hid]


def init_params(key, in_ch, n_hid):
    """HGNN_conv-style init: uniform(-stdv, stdv), stdv = 1/sqrt(out_ft)."""
    k1, k2, k3, k4 = jax.random.split(key, 4)
    stdv = 1.0 / (n_hid ** 0.5)
    w1 = jax.random.uniform(k1, (in_ch, n_hid), jnp.float32, -stdv, stdv)
    b1 = jax.random.uniform(k2, (n_hid,), jnp.float32, -stdv, stdv)
    w2 = jax.random.uniform(k3, (n_hid, n_hid), jnp.float32, -stdv, stdv)
    b2 = jax.random.uniform(k4, (n_hid,), jnp.float32, -stdv, stdv)
    return w1, b1, w2, b2


if __name__ == "__main__":
    key = jax.random.PRNGKey(0)
    k_x, k_g, k_p = jax.random.split(key, 3)

    # Lane-dense, MXU-friendly (but still small) shapes: 256 nodes, 128 features.
    N, in_ch, n_hid = 256, 128, 128

    x = jax.random.normal(k_x, (N, in_ch), jnp.float32)
    a = jax.random.uniform(k_g, (N, N), jnp.float32)
    G = (a + a.T) / (2.0 * N)        # symmetric, normalized-Laplacian-like

    w1, b1, w2, b2 = init_params(k_p, in_ch, n_hid)

    out = hgnn_embedding_forward(x, G, w1, b1, w2, b2, dropout_p=0.5, seed=0)
    out = jax.block_until_ready(out)

    assert out.shape == (N, n_hid)
    assert out.dtype == jnp.float32
    print("KERNEL_OK")
</pallas_src>

<mosaic_0001>
module attributes {stable_mosaic.version = 11 : i64} {
  func.func @_hgnn_conv_kernel(%arg0: i32, %arg1: i32, %arg2: memref<128x128xbf16, #tpu.memory_space<vmem>>, %arg3: memref<128x128xbf16, #tpu.memory_space<vmem>>, %arg4: memref<128x128xbf16, #tpu.memory_space<vmem>>, %arg5: memref<1x128xf32, #tpu.memory_space<vmem>>, %arg6: memref<128x128xf32, #tpu.memory_space<vmem>>, %arg7: memref<128x128xbf16, #tpu.memory_space<vmem>>, %arg8: memref<128x128xf32, #tpu.memory_space<vmem>>) attributes {dimension_semantics = [#tpu.dimension_semantics<parallel>, #tpu.dimension_semantics<arbitrary>], iteration_bounds = array<i64: 2, 2>, scalar_prefetch = 0 : i64, scratch_operands = 1 : i64, tpu.core_type = #tpu.core_type<tc>, window_params = [{transform_indices = @transform_0, window_bounds = array<i64: 128, 128>}, {transform_indices = @transform_1, window_bounds = array<i64: 128, 128>}, {pipeline_mode = #tpu.pipeline_mode<synchronous>, transform_indices = @transform_2, window_bounds = array<i64: 128, 128>}, {pipeline_mode = #tpu.pipeline_mode<synchronous>, transform_indices = @transform_3, window_bounds = array<i64: 1, 128>}, {transform_indices = @transform_4, window_bounds = array<i64: 128, 128>}, {transform_indices = @transform_5, window_bounds = array<i64: 128, 128>}]} {
    %c0_i32 = arith.constant 0 : i32
    %0 = arith.cmpi eq, %arg1, %c0_i32 : i32
    %1 = arith.extui %0 : i1 to i32
    %c0_i32_0 = arith.constant 0 : i32
    %2 = arith.cmpi ne, %1, %c0_i32_0 : i32
    scf.if %2 {
      %cst_14 = arith.constant 0.000000e+00 : f32
      %18 = vector.broadcast %cst_14 : f32 to vector<128x128xf32>
      %c0_15 = arith.constant 0 : index
      %c0_16 = arith.constant 0 : index
      %19 = vector.load %arg8[%c0_15, %c0_16] : memref<128x128xf32, #tpu.memory_space<vmem>>, vector<128x128xf32>
      tpu.vector_store %arg8[%c0_15, %c0_16], %18 {strides = array<i32>} : memref<128x128xf32, #tpu.memory_space<vmem>>, vector<128x128xf32>,
    } else {
    }
    %c0 = arith.constant 0 : index
    %c0_1 = arith.constant 0 : index
    %3 = vector.load %arg3[%c0, %c0_1] : memref<128x128xbf16, #tpu.memory_space<vmem>>, vector<128x128xbf16>
    %c0_2 = arith.constant 0 : index
    %c0_3 = arith.constant 0 : index
    %4 = vector.load %arg4[%c0_2, %c0_3] : memref<128x128xbf16, #tpu.memory_space<vmem>>, vector<128x128xbf16>
    %cst = arith.constant dense<0.000000e+00> : vector<128x128xf32>
    %5 = tpu.matmul %3, %4, %cst {dimension_numbers = #tpu.dot_dimension_numbers<[1], [0], [0], [1], [0, 0, 1, 1], [], []>} : vector<128x128xbf16>, vector<128x128xbf16>, vector<128x128xf32> -> vector<128x128xf32>
    %c0_4 = arith.constant 0 : index
    %c0_5 = arith.constant 0 : index
    %6 = vector.load %arg5[%c0_4, %c0_5] : memref<1x128xf32, #tpu.memory_space<vmem>>, vector<1x128xf32>
    %7 = vector.broadcast %6 : vector<1x128xf32> to vector<128x128xf32>
    %8 = arith.addf %5, %7 : vector<128x128xf32>
    %c0_6 = arith.constant 0 : index
    %c0_7 = arith.constant 0 : index
    %9 = vector.load %arg8[%c0_6, %c0_7] : memref<128x128xf32, #tpu.memory_space<vmem>>, vector<128x128xf32>
    %c0_8 = arith.constant 0 : index
    %c0_9 = arith.constant 0 : index
    %10 = vector.load %arg2[%c0_8, %c0_9] : memref<128x128xbf16, #tpu.memory_space<vmem>>, vector<128x128xbf16>
    %11 = arith.truncf %8 : vector<128x128xf32> to vector<128x128xbf16>
    %cst_10 = arith.constant dense<0.000000e+00> : vector<128x128xf32>
    %12 = tpu.matmul %10, %11, %cst_10 {dimension_numbers = #tpu.dot_dimension_numbers<[1], [0], [0], [1], [0, 0, 1, 1], [], []>} : vector<128x128xbf16>, vector<128x128xbf16>, vector<128x128xf32> -> vector<128x128xf32>
    %13 = arith.addf %9, %12 : vector<128x128xf32>
    %c0_11 = arith.constant 0 : index
    %c0_12 = arith.constant 0 : index
    %14 = vector.load %arg8[%c0_11, %c0_12] : memref<128x128xf32, #tpu.memory_space<vmem>>, vector<128x128xf32>
    tpu.vector_store %arg8[%c0_11, %c0_12], %13 {strides = array<i32>} : memref<128x128xf32, #tpu.memory_space<vmem>>, vector<128x128xf32>,
    %c1_i32 = arith.constant 1 : i32
    %15 = arith.cmpi eq, %arg1, %c1_i32 : i32
    %16 = arith.extui %15 : i1 to i32
    %c0_i32_13 = arith.constant 0 : i32
    %17 = arith.cmpi ne, %16, %c0_i32_13 : i32
    scf.if %17 {
      %c0_14 = arith.constant 0 : index
      %c0_15 = arith.constant 0 : index
      %18 = vector.load %arg8[%c0_14, %c0_15] : memref<128x128xf32, #tpu.memory_space<vmem>>, vector<128x128xf32>
      %cst_16 = arith.constant 0.000000e+00 : f32
      %19 = vector.broadcast %cst_16 : f32 to vector<128x128xf32>
      %20 = arith.maximumf %18, %19 : vector<128x128xf32>
      %c0_17 = arith.constant 0 : index
      %c0_18 = arith.constant 0 : index
      %21 = vector.load %arg6[%c0_17, %c0_18] : memref<128x128xf32, #tpu.memory_space<vmem>>, vector<128x128xf32>
      %22 = arith.mulf %20, %21 : vector<128x128xf32>
      %23 = arith.truncf %22 : vector<128x128xf32> to vector<128x128xbf16>
      %c0_19 = arith.constant 0 : index
      %c0_20 = arith.constant 0 : index
      %24 = vector.load %arg7[%c0_19, %c0_20] : memref<128x128xbf16, #tpu.memory_space<vmem>>, vector<128x128xbf16>
      tpu.vector_store %arg7[%c0_19, %c0_20], %23 {strides = array<i32>} : memref<128x128xbf16, #tpu.memory_space<vmem>>, vector<128x128xbf16>,
    } else {
    }
    return
  }
  func.func @transform_0(%arg0: i32, %arg1: i32) -> (i32, i32) {
    %c0_i32 = arith.constant 0 : i32
    return %arg0, %arg1 : i32, i32
  }
  func.func @transform_1(%arg0: i32, %arg1: i32) -> (i32, i32) {
    %c0_i32 = arith.constant 0 : i32
    %c0_i32_0 = arith.constant 0 : i32
    return %arg1, %c0_i32 : i32, i32
  }
  func.func @transform_2(%arg0: i32, %arg1: i32) -> (i32, i32) {
    %c0_i32 = arith.constant 0 : i32
    %c0_i32_0 = arith.constant 0 : i32
    %c0_i32_1 = arith.constant 0 : i32
    return %c0_i32, %c0_i32_0 : i32, i32
  }
  func.func @transform_3(%arg0: i32, %arg1: i32) -> (i32, i32) {
    %c0_i32 = arith.constant 0 : i32
    %c0_i32_0 = arith.constant 0 : i32
    %c0_i32_1 = arith.constant 0 : i32
    return %c0_i32, %c0_i32_0 : i32, i32
  }
  func.func @transform_4(%arg0: i32, %arg1: i32) -> (i32, i32) {
    %c0_i32 = arith.constant 0 : i32
    %c0_i32_0 = arith.constant 0 : i32
    return %arg0, %c0_i32 : i32, i32
  }
  func.func @transform_5(%arg0: i32, %arg1: i32) -> (i32, i32) {
    %c0_i32 = arith.constant 0 : i32
    %c0_i32_0 = arith.constant 0 : i32
    return %arg0, %c0_i32 : i32, i32
  }
}

</mosaic_0001>

<bundles_post_ra>
// kernel: tpu_custom_call.1
= control target key start
LH: loop header
LB: loop body
LE: loop exit
PB: predicated region body
PF: predicated region fallthrough
CT: control target
= control target key end

     0   :  { %s2360_s0 = inlined_call_operand.hbm [shape: bf16[256,256], index: 0, kind: input, shape index: {}]   ;;  %s2361_s1 = inlined_call_operand.hbm [shape: bf16[256,128], index: 1, kind: input, shape index: {}]   ;;  %s2362_s2 = inlined_call_operand.hbm [shape: bf16[128,128], index: 2, kind: input, shape index: {}]   ;;  %s2363_s3 = inlined_call_operand.vmem [shape: f32[1,128], index: 3, kind: input, shape index: {}]   ;;  %s2364_s4 = inlined_call_operand.hbm [shape: f32[256,128], index: 4, kind: input, shape index: {}]   ;;  %s2365_s5 = inlined_call_operand.hbm [shape: bf16[256,128], index: 5, kind: output, shape index: {}]  }
   0x1   :  { %2384 = sst [smem:[#allocation24_spill]] %s2360_s0 }
   0x2   :  { %2385 = sst [smem:[#allocation25_spill]] %s2361_s1 }
   0x3   :  { %2386 = sst [smem:[#allocation26_spill]] %s2362_s2 }
   0x4   :  { %2387 = sst [smem:[#allocation27_spill]] %s2363_s3 }
   0x5   :  { %2388 = sst [smem:[#allocation28_spill]] %s2365_s5 }
   0x6   :  { %10 = vsyncpa [#allocation4], 0 }
   0x7   :  { %12 = vsyncpa [#allocation4 + $0x1], 0 }
   0x8   :  { %13 = vsyncpa [#allocation7], 0 }
   0x9   :  { %15 = vsyncpa [#allocation7 + $0x1], 0 }
   0xa   :  { %16 = vsyncpa [#allocation10], 0 }
   0xb   :  { %18 = vsyncpa [#allocation10 + $0x1], 0 }
   0xc   :  { %19 = vsyncpa [#allocation5], 0 }
   0xd   :  { %21 = vsyncpa [#allocation5 + $0x1], 0  ;;  %s1860_s18 = smov 0   ;;  %s1862_s19 = smov 0  }
   0xe   :  { %s1864_s20 = smov 0   ;;  %s1866_s21 = smov 0  }
   0xf   :  { %s1868_s22 = smov 0   ;;  %s1870_s23 = smov 0  }
  0x10   :  { %s1872_s24 = smov 0   ;;  %s1874_s25 = smov 0  }
  0x11   :  { %s1876_s26 = smov 0   ;;  %s1878_s27 = smov 0  }
  0x12   :  { %s1880_s28 = smov 0   ;;  %s1882_s29 = smov 0  }
  0x13   :  { %s1884_s30 = smov 0   ;;  %s1886_s6 = smov 0  }
  0x14 LB: > { %2389 = sst [smem:[#allocation17_spill]] %s1792_s25  ;;  %s1931_s7 = sadd.s32 4294967295, %s1816_s6   ;;  %s1816_s6 = sphi %s1886_s6, %s27_s6   ;;  %s1812_s30 = sphi %s1884_s30, %s2452_s30   ;;  %s1808_s29 = sphi %s1882_s29, %s2451_s29   ;;  %s1804_s28 = sphi %s1880_s28, %s2450_s28   ;;  %s1800_s27 = sphi %s1878_s27, %s2449_s27   ;;  %s1796_s26 = sphi %s1876_s26, %s2448_s26   ;;  %s1792_s25 = sphi %s1874_s25, %s2447_s25   ;;  %s1788_s24 = sphi %s1872_s24, %s2437_s24   ;;  %s1784_s23 = sphi %s1870_s23, %s2446_s23   ;;  %s1780_s22 = sphi %s1868_s22, %s2445_s22   ;;  %s1776_s21 = sphi %s1866_s21, %s2444_s21   ;;  %s1772_s20 = sphi %s1864_s20, %s2443_s20   ;;  %s1768_s19 = sphi %s1862_s19, %s2442_s19   ;;  %s1764_s18 = sphi %s1860_s18, %s2441_s18  }
  0x15   : > { %2390 = sst [smem:[#allocation18_spill]] %s1800_s27  ;;  %p1132_p0 = scmp.ge.s32.totalorder %s1816_s6, 1 }
  0x16   : > { %2391 = sst [smem:[#allocation19_spill]] %s1804_s28  ;;  %p2367_p1 = scmp.eq.s32.totalorder %s1931_s7, 0 }
  0x17   : > { %p192_p3 = scmp.lt.s32.totalorder %s1816_s6, 5  ;;  %s1818_s9 = smov [#allocation8]  }
  0x18   : > { %s204_s10 = sshll.u32 %s1818_s9, 4  ;;  %s2394_s2 = sld [smem:[#allocation26_spill]]  ;;  %s205_s10 = int_to_ptr.vmem [resolvable:$true] %s204_s10 }
  0x19   : > { %p1937_p4 = pnand %p1132_p0, %p192_p3 }
  0x1b   : > { %s2392_s8 = scalar_select %p1937_p4, 1, 0 }
  0x1c   : > { %p1374_p5 = pneg %p1937_p4 }
  0x1e   : > { %p1945_p6 = pnand %p1374_p5, %p2367_p1  ;;  %s1540_s14 = scalar_lea.hbm %s2394_s2, 1024 }
  0x1f   : > { %p1541_p7 = scmp.ne.s32.totalorder %s2394_s2, %s1540_s14  ;;  %p1547_p11 = scmp.lt.u32.totalorder %s1540_s14, %s2394_s2 }
  0x20   : > { %p1542_p8 = pneg %p1945_p6 }
  0x22   : > { %p1543_p9 = pnand %p1542_p8, %p1541_p7 }
  0x24   : > { %p1544_p10 = pneg %p1543_p9 }
  0x26   : > { %p1549_p12 = pnand %p1547_p11, %p1544_p10 }
  0x28   : > { %1552 = shalt.err (!%p1549_p12)
}
  0x29   : > { %s1553_s5 = scalar_lea.vmem %s205_s10, 1024  ;;  %p1561_p5 = scmp.lt.s32.totalorder %s205_s10, %s205_s10 }
  0x2a   : > { %p1554_p13 = scmp.ne.s32.totalorder %s205_s10, %s1553_s5  ;;  %p1562_p2 = scmp.lt.s32.totalorder %s1553_s5, %s1553_s5 }
  0x2c   : > { %p1556_p0 = pnand %p1554_p13, %p1542_p8  ;;  %p1563_p1 = por %p1562_p2, %p1561_p5 }
  0x2e   : > { %p1557_p3 = pneg %p1556_p0 }
  0x30   : > { %p1564_p4 = pnand %p1563_p1, %p1557_p3 }
  0x32   : > { %1567 = shalt.err (!%p1564_p4)
}
  0x33   : > { %s2369_s12 = smov 64   ;;  %s2371_s13 = smov 4  }
  0x34   : > { %1377 = dma.hbm_to_vmem [thread:$0]  (!%p1945_p6), %s2394_s2, 1024, %s205_s10, [#allocation7], %s2369_s12, %s2369_s12, %s2371_s13  }
  0x35   : > { %s36_s15 = sadd.s32 1, %s1808_s29  ;;  %s39_s16 = sadd.s32 1, %s1812_s30 }
  0x36   : > { %p37_p1 = scmp.ge.s32.totalorder %s36_s15, 2  ;;  %s48_s17 = sadd.s32 1, %s1796_s26 }
  0x37   : > { %p55_p2 = scmp.ne.s32.totalorder %s1796_s26, %s1792_s25  ;;  %p2379_p4 = scmp.eq.s32.totalorder %s1816_s6, 0 }
  0x38   : > { %s2454_s15 = smov (%p37_p1, %s36_s15), 0  ;;  %s2456_s16 = smov (!%p37_p1, %s39_s16), %s1812_s30 }
  0x39   : > { %2395 = sst [smem:[#allocation20_spill]] %s2454_s15  ;;  %s1979_s11 = ssub.s32 %s1808_s29, %s2454_s15 }
  0x3a   : > { %p1983_p6 = por %p2379_p4, %p55_p2  ;;  %p41_p7 = scmp.ge.s32.totalorder %s2456_s16, 2 }
  0x3b   : > { %p61_p8 = scmp.ne.s32.totalorder %s1792_s25, %s1788_s24  ;;  %p2378_p10 = scmp.lt.s32.totalorder %s1816_s6, 4 }
  0x3c   : > { %s2458_s16 = smov (%p41_p7, %s2456_s16), 0  ;;  %p2398_p11 = scmp.eq.s32.totalorder %s1931_s7, 0 }
  0x3d   : > { %2397 = sst [smem:[#allocation21_spill]] %s2458_s16  ;;  %s221_s5 = sand.u32 1, %s1796_s26  }
  0x3e   : > { %p1995_p12 = por %p2398_p11, %p61_p8  ;;  %s2002_s14 = ssub.s32 %s1812_s30, %s2458_s16 }
  0x3f   : > { %s45_s12 = sor.u32 %s1979_s11, %s2002_s14  ;;  %s1135_s13 = sshll.u32 %s221_s5, 6 }
  0x40   : > { %s2399_s9 = scalar_select %p1995_p12, 1, 0 }
  0x41   : > { %p46_p13 = scmp.eq.s32.totalorder %s45_s12, 0  ;;  %s1199_s24 = sshll.u32 %s1812_s30, 5 }
  0x42   : > { %2400 = sst [smem:[#allocation22_spill]] %s2399_s9  ;;  %s225_s2 = scalar_lea.vmem [#allocation3], %s1135_s13 }
  0x43   : > { %s234_s15 = sshll.u32 %s225_s2, 4  ;;  %s231_s3 = sadd.s32 %s1808_s29, %s1199_s24  ;;  %s2011_s15 = int_to_ptr.vmem [resolvable:$true] %s234_s15 }
  0x44   : > { %s2008_s28 = scalar_select %p46_p13, %s1796_s26, %s48_s17  }
  0x45   : > { %s1138_s27 = sshll.u32 %s231_s3, 6  ;;  %p2017_p0 = pnand %p2378_p10, %p1983_p6 }
  0x46   : > { %2401 = sst [smem:[#allocation23_spill]] %s2008_s28  ;;  %s2026_s2 = scalar_lea.sflag [#allocation4], %s221_s5 }
  0x47   : > { %s2403_s0 = sld [smem:[#allocation24_spill]]  ;;  %p1570_p5 = pneg %p2017_p0 }
  0x4d   : > { %s2024_s12 = scalar_lea.hbm %s2403_s0, %s1138_s27  ;;  %s1573_s16 = scalar_lea.hbm %s2403_s0, 4096 }
  0x4e   : > { %s1568_s3 = scalar_lea.hbm %s2024_s12, 1024  ;;  %p1574_p6 = scmp.lt.u32.totalorder %s2024_s12, %s2403_s0 }
  0x4f   : > { %p1569_p3 = scmp.ne.s32.totalorder %s2024_s12, %s1568_s3  ;;  %p1575_p7 = scmp.lt.u32.totalorder %s1573_s16, %s1568_s3 }
  0x50   : > { %p1577_p11 = scmp.lt.u32.totalorder %s1568_s3, %s2024_s12 }
  0x51   : > { %p1571_p1 = pnand %p1570_p5, %p1569_p3  ;;  %p1576_p8 = por %p1575_p7, %p1574_p6 }
  0x53   : > { %p1572_p2 = pneg %p1571_p1  ;;  %p1578_p13 = por %p1577_p11, %p1576_p8 }
  0x55   : > { %p1579_p10 = pnand %p1578_p13, %p1572_p2 }
  0x57   : > { %1582 = shalt.err (!%p1579_p10)
}
  0x58   : > { %s1583_s10 = scalar_lea.vmem %s2011_s15, 1024  ;;  %s1821_s5 = smov [#allocation3]  }
  0x59   : > { %p1584_p3 = scmp.ne.s32.totalorder %s2011_s15, %s1583_s10  ;;  %s1588_s24 = sshll.u32 %s1821_s5, 4  ;;  %s1589_s24 = int_to_ptr.vmem [resolvable:$false] %s1588_s24 }
  0x5a   : > { %s1590_s13 = scalar_lea.vmem %s1589_s24, 2048  ;;  %p1591_p9 = scmp.lt.s32.totalorder %s2011_s15, %s1589_s24 }
  0x5b   : > { %p1586_p1 = pnand %p1584_p3, %p1570_p5  ;;  %p1592_p6 = scmp.lt.s32.totalorder %s1590_s13, %s1583_s10 }
  0x5d   : > { %p1587_p4 = pneg %p1586_p1  ;;  %p1593_p7 = por %p1592_p6, %p1591_p9 }
  0x5f   : > { %p1594_p8 = pnand %p1593_p7, %p1587_p4 }
  0x61   : > { %1597 = shalt.err (!%p1594_p8)
}
  0x62   : > { %s2381_s3 = smov 128   ;;  %s2404_s25 = smov 4  }
  0x63   : > { %s2405_s16 = smov 64   ;;  %s74_s9 = sadd.s32 1, %s1784_s23 }
  0x64   : > { %1381 = dma.hbm_to_vmem [thread:$0]  (!%p2017_p0), %s2024_s12, 1024, %s2011_s15, %s2026_s2, %s2381_s3, %s2405_s16, %s2404_s25  }
  0x65   : > { %p2406_p4 = scmp.eq.s32.totalorder %s1979_s11, 0  ;;  %p81_p9 = scmp.ne.s32.totalorder %s1784_s23, %s1780_s22 }
  0x66   : > { %p87_p10 = scmp.ne.s32.totalorder %s1780_s22, %s1776_s21  ;;  %s244_s17 = sand.u32 1, %s1816_s6  }
  0x67   : > { %s2061_s27 = scalar_select %p2406_p4, %s1784_s23, %s74_s9  }
  0x68   : > { %s246_s10 = sand.u32 1, %s1784_s23   ;;  %p2407_p5 = scmp.eq.s32.totalorder %s1816_s6, 0 }
  0x69   : > { %p2408_p11 = scmp.eq.s32.totalorder %s1931_s7, 0  ;;  %s1139_s24 = sshll.u32 %s246_s10, 6 }
  0x6a   : > { %p83_p2 = por %p81_p9, %p2407_p5  ;;  %s1200_s13 = sshll.u32 %s1808_s29, 10 }
  0x6b   : > { %p2073_p13 = por %p87_p10, %p2408_p11  ;;  %s2410_s1 = sld [smem:[#allocation25_spill]] }
  0x6c   : > { %s248_s21 = scalar_lea.vmem [#allocation6], %s1139_s24  ;;  %p2411_p0 = scmp.lt.s32.totalorder %s1816_s6, 4 }
  0x6d   : > { %s2409_s5 = scalar_select %p2073_p13, 1, 0 }
  0x6e   : > { %s255_s11 = sshll.u32 %s248_s21, 4  ;;  %p2087_p3 = pnand %p2411_p0, %p83_p2  ;;  %s2083_s11 = int_to_ptr.vmem [resolvable:$true] %s255_s11 }
  0x6f   : > { %s2091_s2 = scalar_lea.sflag [#allocation7], %s244_s17 }
  0x70   : > { %p1600_p6 = pneg %p2087_p3 }
  0x71   : > { %s2081_s15 = scalar_lea.hbm %s2410_s1, %s1200_s13  ;;  %s1603_s10 = scalar_lea.hbm %s2410_s1, 2048 }
  0x72   : > { %s1598_s0 = scalar_lea.hbm %s2081_s15, 1024  ;;  %p1604_p4 = scmp.lt.u32.totalorder %s2081_s15, %s2410_s1 }
  0x73   : > { %p1599_p1 = scmp.ne.s32.totalorder %s2081_s15, %s1598_s0  ;;  %p1605_p9 = scmp.lt.u32.totalorder %s1603_s10, %s1598_s0 }
  0x74   : > { %p1607_p5 = scmp.lt.u32.totalorder %s1598_s0, %s2081_s15 }
  0x75   : > { %p1601_p7 = pnand %p1600_p6, %p1599_p1  ;;  %p1606_p10 = por %p1605_p9, %p1604_p4 }
  0x77   : > { %p1602_p8 = pneg %p1601_p7  ;;  %p1608_p2 = por %p1607_p5, %p1606_p10 }
  0x79   : > { %p1609_p11 = pnand %p1608_p2, %p1602_p8 }
  0x7b   : > { %1612 = shalt.err (!%p1609_p11)
}
  0x7c   : > { %s1613_s17 = scalar_lea.vmem %s2083_s11, 1024  ;;  %s1823_s21 = smov [#allocation6]  }
  0x7d   : > { %p1614_p0 = scmp.ne.s32.totalorder %s2083_s11, %s1613_s17  ;;  %s1618_s28 = sshll.u32 %s1823_s21, 4  ;;  %s1619_s28 = int_to_ptr.vmem [resolvable:$false] %s1618_s28 }
  0x7e   : > { %s1620_s9 = scalar_lea.vmem %s1619_s28, 2048  ;;  %p1621_p13 = scmp.lt.s32.totalorder %s2083_s11, %s1619_s28 }
  0x7f   : > { %p1616_p1 = pnand %p1614_p0, %p1600_p6  ;;  %p1622_p4 = scmp.lt.s32.totalorder %s1620_s9, %s1613_s17 }
  0x81   : > { %p1617_p7 = pneg %p1616_p1  ;;  %p1623_p9 = por %p1622_p4, %p1621_p13 }
  0x83   : > { %p1624_p10 = pnand %p1623_p9, %p1617_p7 }
  0x85   : > { %1627 = shalt.err (!%p1624_p10)
}
  0x86   : > { %1384 = dma.hbm_to_vmem [thread:$0]  (!%p2087_p3), %s2081_s15, 1024, %s2083_s11, %s2091_s2, %s2405_s16, %s2405_s16, %s2404_s25  }
  0x87   : > { %s1131_s12 = sadd.s32 4294967294, %s1816_s6   ;;  %p140_p13 = scmp.eq.s32.totalorder %s2002_s14, 0 }
  0x88   : > { %s142_s0 = sadd.s32 1, %s1772_s20  ;;  %p149_p6 = scmp.ne.s32.totalorder %s1772_s20, %s1768_s19 }
  0x89   : > { %p155_p8 = scmp.ne.s32.totalorder %s1768_s19, %s1764_s18  ;;  %p2413_p5 = scmp.eq.s32.totalorder %s1816_s6, 0 }
  0x8a   : > { %s2130_s10 = scalar_select %p140_p13, %s1772_s20, %s142_s0  }
  0x8b   : > { %p151_p2 = por %p149_p6, %p2413_p5  ;;  %p2414_p11 = scmp.eq.s32.totalorder %s1931_s7, 0 }
  0x8c   : > { %p2416_p1 = scmp.eq.s32.totalorder %s1931_s7, 3  ;;  %p185_p3 = scmp.eq.s32.totalorder %s1131_s12, 3 }
  0x8d   : > { %p2136_p0 = por %p155_p8, %p2414_p11  ;;  %s265_s25 = sand.u32 1, %s1772_s20  }
  0x8e   : > { %p2142_p7 = por %p2416_p1, %p149_p6  ;;  %s1201_s14 = sshll.u32 %s1812_s30, 11 }
  0x8f   : > { %s2415_s24 = scalar_select %p2136_p0, 1, 0 }
  0x90   : > { %s2417_s13 = scalar_select %p2142_p7, 1, 0 }
  0x91   : > { %p2148_p4 = por %p185_p3, %p155_p8  ;;  %s1142_s15 = sshll.u32 %s265_s25, 7 }
  0x92   : > { %s2155_s17 = scalar_lea.hbm %s2364_s4, %s1201_s14  ;;  %p2419_p9 = scmp.lt.s32.totalorder %s1816_s6, 4 }
  0x93   : > { %s2418_s16 = scalar_select %p2148_p4, 1, 0 }
  0x94   : > { %p2159_p10 = pnand %p2419_p9, %p151_p2  ;;  %s269_s28 = scalar_lea.vmem [#allocation9], %s1142_s15 }
  0x95   : > { %s276_s9 = sshll.u32 %s269_s28, 4  ;;  %s2165_s12 = scalar_lea.sflag [#allocation10], %s265_s25  ;;  %s2163_s9 = int_to_ptr.vmem [resolvable:$true] %s276_s9 }
  0x96   : > { %s1628_s0 = scalar_lea.hbm %s2155_s17, 2048  ;;  %p1630_p6 = pneg %p2159_p10 }
  0x97   : > { %p1629_p13 = scmp.ne.s32.totalorder %s2155_s17, %s1628_s0  ;;  %s1633_s2 = scalar_lea.hbm %s2364_s4, 4096 }
  0x98   : > { %p1634_p2 = scmp.lt.u32.totalorder %s2155_s17, %s2364_s4  ;;  %p1635_p11 = scmp.lt.u32.totalorder %s1633_s2, %s1628_s0 }
  0x99   : > { %p1631_p8 = pnand %p1630_p6, %p1629_p13  ;;  %p1637_p3 = scmp.lt.u32.totalorder %s1628_s0, %s2155_s17 }
  0x9a   : > { %p1636_p1 = por %p1635_p11, %p1634_p2 }
  0x9b   : > { %p1632_p5 = pneg %p1631_p8 }
  0x9c   : > { %p1638_p9 = por %p1637_p3, %p1636_p1 }
  0x9e   : > { %p1639_p4 = pnand %p1638_p9, %p1632_p5 }
  0xa0   : > { %1642 = shalt.err (!%p1639_p4)
}
  0xa1   : > { %s1643_s25 = scalar_lea.vmem %s2163_s9, 2048  ;;  %s1824_s15 = smov [#allocation9]  }
  0xa2   : > { %p1644_p13 = scmp.ne.s32.totalorder %s2163_s9, %s1643_s25  ;;  %s1648_s28 = sshll.u32 %s1824_s15, 4  ;;  %s1649_s28 = int_to_ptr.vmem [resolvable:$false] %s1648_s28 }
  0xa3   : > { %s1650_s1 = scalar_lea.vmem %s1649_s28, 4096  ;;  %p1651_p0 = scmp.lt.s32.totalorder %s2163_s9, %s1649_s28 }
  0xa4   : > { %p1646_p8 = pnand %p1644_p13, %p1630_p6  ;;  %p1652_p2 = scmp.lt.s32.totalorder %s1650_s1, %s1643_s25 }
  0xa6   : > { %p1647_p7 = pneg %p1646_p8  ;;  %p1653_p11 = por %p1652_p2, %p1651_p0 }
  0xa8   : > { %p1654_p1 = pnand %p1653_p11, %p1647_p7 }
  0xaa   : > { %1657 = shalt.err (!%p1654_p1)
}
  0xab   : > { %s1825_s3 = smov 8   ;;  %s2421_s0 = smov 128  }
  0xac   : > { %1387 = dma.hbm_to_vmem [thread:$0]  (!%p2159_p10), %s2155_s17, 2048, %s2163_s9, %s2165_s12, %s2421_s0, %s2421_s0, %s1825_s3  }
  0xad   : > { %p2422_p4 = scmp.ne.s32.totalorder %s2392_s8, 0 }
  0xae   : > { %s2423_s14 = sld [smem:[#allocation17_spill]] (!%p2422_p4) }
  0xaf   : > { %288 = sbr.rel (%p2422_p4) target bundleno = 780 (0x30c), region = 40 }
  0xb4   : > { %s290_s2 = sand.u32 (!%p2422_p4), 1, %s2423_s14  }
  0xb5   : > { %s1146_s15 = sshll.u32 (!%p2422_p4), %s290_s2, 6  ;;  %s291_s25 = scalar_lea.sflag (!%p2422_p4), [#allocation4], %s290_s2 }
  0xb6   : > { %s2198_s28 = scalar_lea.vmem [#allocation3], %s1146_s15 }
  0xb7   : > { %1743 = dma.done.wait (%p1995_p12), %s291_s25, 1024  }
  0xb8   : > { %1745 = vsyncadd (%p1995_p12), %s291_s25, 4294966272  ;;  %s299_s21 = sand.u32 1, %s1931_s7   ;;  %s301_s17 = sand.u32 1, %s1780_s22  }
  0xb9   : > { %s1147_s9 = sshll.u32 %s301_s17, 6  ;;  %s300_s8 = scalar_lea.sflag [#allocation7], %s299_s21 }
  0xba   : > { %s2206_s12 = scalar_lea.vmem [#allocation6], %s1147_s9  ;;  %p2425_p0 = scmp.ne.s32.totalorder %s2409_s5, 0 }
  0xbc   : > { %1747 = dma.done.wait (%p2425_p0), %s300_s8, 1024  }
  0xbd   : > { %1749 = vsyncadd (%p2425_p0), %s300_s8, 4294966272  ;;  %p2426_p7 = scmp.eq.s32.totalorder %s1931_s7, 0 }
  0xbf   : > { %1751 = dma.done.wait (%p2426_p7), [#allocation7], 1024   ;;  %p2427_p10 = pmov %p2426_p7 }
  0xc0   : > { %s2217_s1 = sand.u32 1, %s1768_s19   ;;  %p2428_p12 = scmp.ne.s32.totalorder %s2415_s24, 0 }
  0xc1   : > { %1753 = vsyncadd (%p2427_p10), [#allocation7], 4294966272  ;;  %s1149_s3 = sshll.u32 %s2217_s1, 7  ;;  %s313_s0 = scalar_lea.sflag [#allocation10], %s2217_s1 }
  0xc2   : > { %s2221_s14 = scalar_lea.vmem [#allocation9], %s1149_s3 }
  0xc3   : > { %1755 = dma.done.wait (%p2428_p12), %s313_s0, 2048  }
  0xc4   : > { %1757 = vsyncadd (%p2428_p12), %s313_s0, 4294965248  ;;  %s1150_s5 = sshll.u32 %s2217_s1, 6  ;;  %s2429_s7 = sld [smem:[#allocation18_spill]] }
  0xc5   : > { %s2228_s11 = scalar_lea.vmem [#allocation11], %s1150_s5 }
  0xca   : > { %p1151_p6 = scmp.ne.s32.totalorder %s2429_s7, 0 }
  0xcb   : > { %v1826_v0 = vmov (!%p1151_p6), 0.0  }
  0xcc   : > { %361 = sbr.rel (%p1151_p6) target bundleno = 212 (0xd4), region = 60  ;;  %362 = vst [vmem:[#allocation2] sm:$0xff] (!%p1151_p6), %v1826_v0  ;;  %363 = vst [vmem:[#allocation2 + $0x8] sm:$0xff] (!%p1151_p6), %v1826_v0 }
  0xcd   : > { %364 = vst [vmem:[#allocation2 + $0x10] sm:$0xff] (!%p1151_p6), %v1826_v0  ;;  %365 = vst [vmem:[#allocation2 + $0x18] sm:$0xff] (!%p1151_p6), %v1826_v0 }
  0xce   : > { %366 = vst [vmem:[#allocation2 + $0x20] sm:$0xff] (!%p1151_p6), %v1826_v0  ;;  %367 = vst [vmem:[#allocation2 + $0x28] sm:$0xff] (!%p1151_p6), %v1826_v0 }
  0xcf   : > { %368 = vst [vmem:[#allocation2 + $0x30] sm:$0xff] (!%p1151_p6), %v1826_v0  ;;  %369 = vst [vmem:[#allocation2 + $0x38] sm:$0xff] (!%p1151_p6), %v1826_v0 }
  0xd0   : > { %370 = vst [vmem:[#allocation2 + $0x40] sm:$0xff] (!%p1151_p6), %v1826_v0  ;;  %371 = vst [vmem:[#allocation2 + $0x48] sm:$0xff] (!%p1151_p6), %v1826_v0 }
  0xd1   : > { %372 = vst [vmem:[#allocation2 + $0x50] sm:$0xff] (!%p1151_p6), %v1826_v0  ;;  %373 = vst [vmem:[#allocation2 + $0x58] sm:$0xff] (!%p1151_p6), %v1826_v0 }
  0xd2   : > { %374 = vst [vmem:[#allocation2 + $0x60] sm:$0xff] (!%p1151_p6), %v1826_v0  ;;  %375 = vst [vmem:[#allocation2 + $0x68] sm:$0xff] (!%p1151_p6), %v1826_v0 }
  0xd3   : > { %376 = vst [vmem:[#allocation2 + $0x70] sm:$0xff] %v1826_v0  ;;  %377 = vst [vmem:[#allocation2 + $0x78] sm:$0xff] %v1826_v0 }
  0xd4 PF: > { %v1516_v1 = vld [vmem:[#allocation8] sm:$0xff]   ;;  %v1517_v2 = vld [vmem:[#allocation8 + $0x8] sm:$0xff]   ;;  %v1518_v3 = vld [vmem:[#allocation8 + $0x10] sm:$0xff]   ;;  %s2430_s15 = sld [smem:[#allocation27_spill]]  ;;  %s2431_s25 = sld [smem:[#allocation18_spill]] }
  0xd5   : > { %1298 = vmatprep.subr.bf16.mxu0 %v1516_v1  ;;  %v1519_v4 = vld [vmem:[#allocation8 + $0x18] sm:$0xff]   ;;  %v1524_v5 = vld [vmem:[%s2206_s12] sm:$0xff]   ;;  %v1521_v7 = vld [vmem:[#allocation8 + $0x28] sm:$0xff]  }
  0xd6   : > { %1299 = vmatpush3.bf16.msra.mxu0 %v1516_v1  ;;  %1314 = vmatprep.mubr.bf16.mxu0 %v1524_v5  ;;  %v1520_v6 = vld [vmem:[#allocation8 + $0x20] sm:$0xff]   ;;  %v1522_v8 = vld [vmem:[#allocation8 + $0x30] sm:$0xff]   ;;  %v1523_v9 = vld [vmem:[#allocation8 + $0x38] sm:$0xff]  }
  0xd7   : > { %1300 = vmatprep.subr.bf16.mxu0 %v1517_v2  ;;  %v1525_v10 = vld [vmem:[%s2206_s12 + $0x8] sm:$0xff]   ;;  %v1526_v11 = vld [vmem:[%s2206_s12 + $0x10] sm:$0xff]   ;;  %v1527_v12 = vld [vmem:[%s2206_s12 + $0x18] sm:$0xff]  }
  0xd8   : > { %v1528_v13 = vld [vmem:[%s2206_s12 + $0x20] sm:$0xff]   ;;  %v1529_v14 = vld [vmem:[%s2206_s12 + $0x28] sm:$0xff]   ;;  %v1530_v15 = vld [vmem:[%s2206_s12 + $0x30] sm:$0xff]  }
  0xd9   : > { %v1531_v16 = vld [vmem:[%s2206_s12 + $0x38] sm:$0xff]   ;;  %v1532_v17 = vld [vmem:[%s2198_s28] sm:$0xff]   ;;  %v1533_v59 = vld [vmem:[%s2198_s28 + $0x8] sm:$0xff]  }
  0xda   : > { %1301 = vmatpush3.bf16.msra.mxu0 %v1517_v2  ;;  %1346 = vmatprep.mubr.bf16.mxu1 %v1532_v17  ;;  %v1152_v19 = vld [vmem:[%s2430_s15] ss:$0 sm:$0xff]  ;;  %v1534_v60 = vld [vmem:[%s2198_s28 + $0x10] sm:$0xff]   ;;  %v1535_v61 = vld [vmem:[%s2198_s28 + $0x18] sm:$0xff]   ;;  %p1177_p5 = scmp.ne.s32.totalorder %s2431_s25, 1 }
  0xdb   : > { %1302 = vmatprep.subr.bf16.mxu0 %v1518_v3  ;;  %v1536_v62 = vld [vmem:[%s2198_s28 + $0x20] sm:$0xff]   ;;  %v1537_v63 = vld [vmem:[%s2198_s28 + $0x28] sm:$0xff]   ;;  %v1538_v0 = vld [vmem:[%s2198_s28 + $0x30] sm:$0xff]  }
  0xdc   : > { %v1539_v1 = vld [vmem:[%s2198_s28 + $0x38] sm:$0xff]   ;;  %v612_v2 = vld [vmem:[#allocation2 + $0x10] sm:$0xff] }
  0xdd   : > { %v613_v5 = vld [vmem:[#allocation2 + $0x18] sm:$0xff] }
  0xde   : > { %1303 = vmatpush3.bf16.msra.mxu0 %v1518_v3  ;;  %v610_v3 = vld [vmem:[#allocation2] sm:$0xff]  ;;  %v617_v17 = vld [vmem:[#allocation2 + $0x38] sm:$0xff] }
  0xdf   : > { %1304 = vmatprep.subr.bf16.mxu0 %v1519_v4 }
  0xe2   : > { %1305 = vmatpush3.bf16.msra.mxu0 %v1519_v4 }
  0xe3   : > { %1306 = vmatprep.subr.bf16.mxu0 %v1520_v6 }
  0xe6   : > { %1307 = vmatpush3.bf16.msra.mxu0 %v1520_v6 }
  0xe7   : > { %1308 = vmatprep.subr.bf16.mxu0 %v1521_v7 }
  0xea   : > { %1309 = vmatpush3.bf16.msra.mxu0 %v1521_v7 }
  0xeb   : > { %1310 = vmatprep.subr.bf16.mxu0 %v1522_v8 }
  0xee   : > { %1311 = vmatpush3.bf16.msra.mxu0 %v1522_v8  ;;  %v611_v8 = vld [vmem:[#allocation2 + $0x8] sm:$0xff] }
  0xef   : > { %1312 = vmatprep.subr.bf16.mxu0 %v1523_v9 }
  0xf2   : > { %1313 = vmatpush3.bf16.msra.mxu0 %v1523_v9 }
  0xf5   : > { %1315 = vmatmul.mubr.bf16.vlgmr.msra.gmra.mrb[0].mxu0 %v1525_v10 }
  0xf6   : > { %1318 = vmatprep.mubr.bf16.mxu0 %v1526_v11 }
  0xfd   : > { %1319 = vmatmul.mubr.bf16.gmra.mrb[4].mxu0 %v1527_v12 }
  0xfe   : > { %1322 = vmatprep.mubr.bf16.mxu0 %v1528_v13 }
 0x105   : > { %1323 = vmatmul.mubr.bf16.gmra.mrb[8].mxu0 %v1529_v14  ;;  %v616_v14 = vld [vmem:[#allocation2 + $0x30] sm:$0xff] }
 0x106   : > { %1326 = vmatprep.mubr.bf16.mxu0 %v1530_v15  ;;  %v614_v15 = vld [vmem:[#allocation2 + $0x20] sm:$0xff] }
 0x10d   : > { %1327 = vmatmul.mubr.bf16.gmra.mrb[12].mxu0 %v1531_v16 }
 0x1c8   : > { %v1316_v18 = vpop.f32.mrb[0].mxu0 }
 0x1c9   : > { %v547_v20 = vpop.f32.mrb[1].mxu0  ;;  %v556_v22 = vadd.f32 %v1316_v18, %v1152_v19 }
 0x1ca   : > { %v1317_v21 = vpop.f32.mrb[2].mxu0  ;;  %v548_v25 = vadd.f32 %v1152_v19, %v547_v20  ;;  %v615_v20 = vld [vmem:[#allocation2 + $0x28] sm:$0xff] }
 0x1cb   : > { %v559_v23 = vadd.f32 %v1317_v21, %v1152_v19  ;;  %v550_v24 = vpop.f32.mrb[3].mxu0 }
 0x1cc   : > { %v551_v26 = vadd.f32 %v1152_v19, %v550_v24 }
 0x1cd   : > { %v643_v27 = vpack.c.bf16 %v559_v23, %v556_v22 }
 0x1ce   : > { %v642_v28 = vpack.c.bf16 %v551_v26, %v548_v25  ;;  %v620_v26 = vld [vmem:[#allocation2 + $0x50] sm:$0xff] }
 0x1d0   : > { %v1320_v29 = vpop.f32.mrb[4].mxu0  ;;  %1330 = vmatprep.subr.bf16.mxu1 %v642_v28 }
 0x1d1   : > { %v563_v30 = vpop.f32.mrb[5].mxu0  ;;  %1331 = vmatpush3.bf16.msra.mxu1 %v642_v28  ;;  %v572_v32 = vadd.f32 %v1320_v29, %v1152_v19  ;;  %v621_v29 = vld [vmem:[#allocation2 + $0x58] sm:$0xff] }
 0x1d2   : > { %v1321_v31 = vpop.f32.mrb[6].mxu0  ;;  %1332 = vmatprep.subr.bf16.mxu1 %v643_v27  ;;  %v564_v35 = vadd.f32 %v1152_v19, %v563_v30 }
 0x1d3   : > { %v575_v33 = vadd.f32 %v1321_v31, %v1152_v19  ;;  %v566_v34 = vpop.f32.mrb[7].mxu0 }
 0x1d4   : > { %v567_v36 = vadd.f32 %v1152_v19, %v566_v34 }
 0x1d5   : > { %v645_v37 = vpack.c.bf16 %v575_v33, %v572_v32  ;;  %1333 = vmatpush3.bf16.msra.mxu1 %v643_v27  ;;  %v618_v27 = vld [vmem:[#allocation2 + $0x40] sm:$0xff]  ;;  %v619_v32 = vld [vmem:[#allocation2 + $0x48] sm:$0xff] }
 0x1d6   : > { %v644_v38 = vpack.c.bf16 %v567_v36, %v564_v35 }
 0x1d8   : > { %v1324_v39 = vpop.f32.mrb[8].mxu0  ;;  %1334 = vmatprep.subr.bf16.mxu1 %v644_v38 }
 0x1d9   : > { %v579_v40 = vpop.f32.mrb[9].mxu0  ;;  %1335 = vmatpush3.bf16.msra.mxu1 %v644_v38  ;;  %v588_v42 = vadd.f32 %v1324_v39, %v1152_v19  ;;  %v624_v38 = vld [vmem:[#allocation2 + $0x70] sm:$0xff]  ;;  %v622_v39 = vld [vmem:[#allocation2 + $0x60] sm:$0xff] }
 0x1da   : > { %v1325_v41 = vpop.f32.mrb[10].mxu0  ;;  %1336 = vmatprep.subr.bf16.mxu1 %v645_v37  ;;  %v580_v45 = vadd.f32 %v1152_v19, %v579_v40 }
 0x1db   : > { %v591_v43 = vadd.f32 %v1325_v41, %v1152_v19  ;;  %v582_v44 = vpop.f32.mrb[11].mxu0  ;;  %v625_v41 = vld [vmem:[#allocation2 + $0x78] sm:$0xff] }
 0x1dc   : > { %v583_v46 = vadd.f32 %v1152_v19, %v582_v44  ;;  %v623_v44 = vld [vmem:[#allocation2 + $0x68] sm:$0xff] }
 0x1dd   : > { %v647_v47 = vpack.c.bf16 %v591_v43, %v588_v42  ;;  %1337 = vmatpush3.bf16.msra.mxu1 %v645_v37 }
 0x1de   : > { %v646_v48 = vpack.c.bf16 %v583_v46, %v580_v45 }
 0x1e0   : > { %v1328_v49 = vpop.f32.mrb[12].mxu0  ;;  %1338 = vmatprep.subr.bf16.mxu1 %v646_v48 }
 0x1e1   : > { %v595_v50 = vpop.f32.mrb[13].mxu0  ;;  %1339 = vmatpush3.bf16.msra.mxu1 %v646_v48  ;;  %v604_v52 = vadd.f32 %v1328_v49, %v1152_v19 }
 0x1e2   : > { %v1329_v51 = vpop.f32.mrb[14].mxu0  ;;  %1340 = vmatprep.subr.bf16.mxu1 %v647_v47  ;;  %v596_v55 = vadd.f32 %v1152_v19, %v595_v50 }
 0x1e3   : > { %v607_v53 = vadd.f32 %v1329_v51, %v1152_v19  ;;  %v598_v54 = vpop.f32.mrb[15].mxu0 }
 0x1e4   : > { %v599_v56 = vadd.f32 %v1152_v19, %v598_v54 }
 0x1e5   : > { %v649_v57 = vpack.c.bf16 %v607_v53, %v604_v52  ;;  %1341 = vmatpush3.bf16.msra.mxu1 %v647_v47  ;;  %v863_v52 = vld [vmem:[%s2221_s14] sm:$0xff] (!%p1177_p5) }
 0x1e6   : > { %v648_v58 = vpack.c.bf16 %v599_v56, %v596_v55  ;;  %v864_v55 = vld [vmem:[%s2221_s14 + $0x8] sm:$0xff] (!%p1177_p5) }
 0x1e8   : > { %1342 = vmatprep.subr.bf16.mxu1 %v648_v58 }
 0x1e9   : > { %1343 = vmatpush3.bf16.msra.mxu1 %v648_v58 }
 0x1ea   : > { %1344 = vmatprep.subr.bf16.mxu1 %v649_v57 }
 0x1ed   : > { %1345 = vmatpush3.bf16.msra.mxu1 %v649_v57 }
 0x1f0   : > { %1347 = vmatmul.mubr.bf16.vlgmr.msra.gmra.mrb[0].mxu1 %v1533_v59 }
 0x1f1   : > { %1350 = vmatprep.mubr.bf16.mxu1 %v1534_v60  ;;  %v865_v60 = vld [vmem:[%s2221_s14 + $0x10] sm:$0xff] (!%p1177_p5) }
 0x1f8   : > { %1351 = vmatmul.mubr.bf16.gmra.mrb[4].mxu1 %v1535_v61  ;;  %v866_v61 = vld [vmem:[%s2221_s14 + $0x18] sm:$0xff] (!%p1177_p5) }
 0x1f9   : > { %1354 = vmatprep.mubr.bf16.mxu1 %v1536_v62 }
 0x200   : > { %1355 = vmatmul.mubr.bf16.gmra.mrb[8].mxu1 %v1537_v63 }
 0x201   : > { %1358 = vmatprep.mubr.bf16.mxu1 %v1538_v0 }
 0x208   : > { %1359 = vmatmul.mubr.bf16.gmra.mrb[12].mxu1 %v1539_v1 }
 0x2c3   : > { %v1348_v4 = vpop.f32.mrb[0].mxu1 }
 0x2c4   : > { %v797_v6 = vadd.f32 %v1348_v4, %v612_v2  ;;  %v732_v7 = vpop.f32.mrb[1].mxu1  ;;  %v868_v4 = vld [vmem:[%s2221_s14 + $0x28] sm:$0xff] (!%p1177_p5) }
 0x2c5   : > { %v795_v9 = vadd.f32 %v732_v7, %v610_v3  ;;  %v1349_v10 = vpop.f32.mrb[2].mxu1  ;;  %v867_v3 = vld [vmem:[%s2221_s14 + $0x20] sm:$0xff] (!%p1177_p5) }
 0x2c6   : > { %813 = vst [vmem:[#allocation2 + $0x10] sm:$0xff] %v797_v6  ;;  %v798_v11 = vadd.f32 %v1349_v10, %v613_v5  ;;  %v735_v12 = vpop.f32.mrb[3].mxu1  ;;  %v869_v10 = vld [vmem:[%s2221_s14 + $0x30] sm:$0xff] (!%p1177_p5) }
 0x2c7   : > { %811 = vst [vmem:[#allocation2] sm:$0xff] %v795_v9  ;;  %v796_v13 = vadd.f32 %v735_v12, %v611_v8 }
 0x2c8   : > { %814 = vst [vmem:[#allocation2 + $0x18] sm:$0xff] %v798_v11 }
 0x2c9   : > { %812 = vst [vmem:[#allocation2 + $0x8] sm:$0xff] %v796_v13 }
 0x2cb   : > { %v1352_v16 = vpop.f32.mrb[4].mxu1 }
 0x2cc   : > { %v801_v18 = vadd.f32 %v1352_v16, %v616_v14  ;;  %v748_v19 = vpop.f32.mrb[5].mxu1 }
 0x2cd   : > { %v799_v21 = vadd.f32 %v748_v19, %v614_v15  ;;  %v1353_v22 = vpop.f32.mrb[6].mxu1  ;;  %v833_v56 = vld [vmem:[#allocation2 + $0x10] sm:$0xff] (!%p1177_p5)  ;;  %v870_v15 = vld [vmem:[%s2221_s14 + $0x38] sm:$0xff] (!%p1177_p5) }
 0x2ce   : > { %817 = vst [vmem:[#allocation2 + $0x30] sm:$0xff] %v801_v18  ;;  %v802_v23 = vadd.f32 %v1353_v22, %v617_v17  ;;  %v751_v24 = vpop.f32.mrb[7].mxu1  ;;  %v831_v50 = vld [vmem:[#allocation2] sm:$0xff] (!%p1177_p5)  ;;  %v849_v58 = vmax.f32 (!%p1177_p5), %v833_v56, 0.0 }
 0x2cf   : > { %815 = vst [vmem:[#allocation2 + $0x20] sm:$0xff] %v799_v21  ;;  %v800_v25 = vadd.f32 %v751_v24, %v615_v20  ;;  %v847_v53 = vmax.f32 (!%p1177_p5), %v831_v50, 0.0  ;;  %v834_v57 = vld [vmem:[#allocation2 + $0x18] sm:$0xff] (!%p1177_p5)  ;;  %v871_v22 = vld [vmem:[%s2221_s14 + $0x40] sm:$0xff] (!%p1177_p5) }
 0x2d0   : > { %818 = vst [vmem:[#allocation2 + $0x38] sm:$0xff] %v802_v23  ;;  %v832_v51 = vld [vmem:[#allocation2 + $0x8] sm:$0xff] (!%p1177_p5)  ;;  %v850_v59 = vmax.f32 (!%p1177_p5), %v834_v57, 0.0  ;;  %v881_v5 = vmul.f32 (!%p1177_p5), %v865_v60, %v849_v58  ;;  %v878_v50 = vld [vmem:[%s2221_s14 + $0x78] sm:$0xff] (!%p1177_p5) }
 0x2d1   : > { %816 = vst [vmem:[#allocation2 + $0x28] sm:$0xff] %v800_v25  ;;  %v848_v54 = vmax.f32 (!%p1177_p5), %v832_v51, 0.0  ;;  %v879_v63 = vmul.f32 (!%p1177_p5), %v863_v52, %v847_v53  ;;  %v872_v23 = vld [vmem:[%s2221_s14 + $0x48] sm:$0xff] (!%p1177_p5) }
 0x2d2   : > { %v882_v6 = vmul.f32 (!%p1177_p5), %v866_v61, %v850_v59 }
 0x2d3   : > { %v1356_v28 = vpop.f32.mrb[8].mxu1  ;;  %v880_v0 = vmul.f32 (!%p1177_p5), %v864_v55, %v848_v54 }
 0x2d4   : > { %v805_v30 = vadd.f32 %v1356_v28, %v620_v26  ;;  %v764_v31 = vpop.f32.mrb[9].mxu1  ;;  %v1227_v18 = vpack.c.bf16 (!%p1177_p5), %v882_v6, %v881_v5 }
 0x2d5   : > { %v803_v33 = vadd.f32 %v764_v31, %v618_v27  ;;  %v1357_v34 = vpop.f32.mrb[10].mxu1  ;;  %v837_v8 = vld [vmem:[#allocation2 + $0x30] sm:$0xff] (!%p1177_p5)  ;;  %v1222_v11 = vpack.c.bf16 (!%p1177_p5), %v880_v0, %v879_v63 }
 0x2d6   : > { %821 = vst [vmem:[#allocation2 + $0x50] sm:$0xff] %v805_v30  ;;  %v806_v35 = vadd.f32 %v1357_v34, %v621_v29  ;;  %v767_v36 = vpop.f32.mrb[11].mxu1  ;;  %v835_v62 = vld [vmem:[#allocation2 + $0x20] sm:$0xff] (!%p1177_p5)  ;;  %v853_v13 = vmax.f32 (!%p1177_p5), %v837_v8, 0.0  ;;  %v873_v29 = vld [vmem:[%s2221_s14 + $0x50] sm:$0xff] (!%p1177_p5)  ;;  %v874_v30 = vld [vmem:[%s2221_s14 + $0x58] sm:$0xff] (!%p1177_p5) }
 0x2d7   : > { %819 = vst [vmem:[#allocation2 + $0x40] sm:$0xff] %v803_v33  ;;  %v804_v37 = vadd.f32 %v767_v36, %v619_v32  ;;  %v851_v2 = vmax.f32 (!%p1177_p5), %v835_v62, 0.0  ;;  %v838_v9 = vld [vmem:[#allocation2 + $0x38] sm:$0xff] (!%p1177_p5)  ;;  %1223 = vst [vmem:[%s2228_s11] sm:$0xff] (!%p1177_p5), %v1222_v11  }
 0x2d8   : > { %822 = vst [vmem:[#allocation2 + $0x58] sm:$0xff] %v806_v35  ;;  %v836_v1 = vld [vmem:[#allocation2 + $0x28] sm:$0xff] (!%p1177_p5)  ;;  %v854_v14 = vmax.f32 (!%p1177_p5), %v838_v9, 0.0  ;;  %v885_v25 = vmul.f32 (!%p1177_p5), %v869_v10, %v853_v13  ;;  %1259 = vst [vmem:[%s2228_s11 + $0x8] sm:$0xff] (!%p1177_p5), %v1227_v18  }
 0x2d9   : > { %820 = vst [vmem:[#allocation2 + $0x48] sm:$0xff] %v804_v37  ;;  %v852_v7 = vmax.f32 (!%p1177_p5), %v836_v1, 0.0  ;;  %v883_v12 = vmul.f32 (!%p1177_p5), %v867_v3, %v851_v2  ;;  %v875_v37 = vld [vmem:[%s2221_s14 + $0x60] sm:$0xff] (!%p1177_p5) }
 0x2da   : > { %v886_v26 = vmul.f32 (!%p1177_p5), %v870_v15, %v854_v14 }
 0x2db   : > { %v1360_v40 = vpop.f32.mrb[12].mxu1  ;;  %830 = sbr.rel (%p1177_p5) target bundleno = 752 (0x2f0), region = 64  ;;  %v884_v19 = vmul.f32 (!%p1177_p5), %v868_v4, %v852_v7 }
 0x2dc   : > { %v809_v42 = vadd.f32 %v1360_v40, %v624_v38  ;;  %v780_v43 = vpop.f32.mrb[13].mxu1  ;;  %v1237_v38 = vpack.c.bf16 (!%p1177_p5), %v886_v26, %v885_v25 }
 0x2dd   : > { %v807_v45 = vadd.f32 %v780_v43, %v622_v39  ;;  %v1361_v46 = vpop.f32.mrb[14].mxu1  ;;  %v841_v24 = vld [vmem:[#allocation2 + $0x50] sm:$0xff] (!%p1177_p5)  ;;  %v1232_v31 = vpack.c.bf16 (!%p1177_p5), %v884_v19, %v883_v12 }
 0x2de   : > { %825 = vst [vmem:[#allocation2 + $0x70] sm:$0xff] %v809_v42  ;;  %v810_v47 = vadd.f32 %v1361_v46, %v625_v41  ;;  %v783_v48 = vpop.f32.mrb[15].mxu1  ;;  %v839_v16 = vld [vmem:[#allocation2 + $0x40] sm:$0xff] (!%p1177_p5)  ;;  %v857_v28 = vmax.f32 (!%p1177_p5), %v841_v24, 0.0  ;;  %v876_v42 = vld [vmem:[%s2221_s14 + $0x68] sm:$0xff] (!%p1177_p5)  ;;  %1261 = vst [vmem:[%s2228_s11 + $0x18] sm:$0xff] (!%p1177_p5), %v1237_v38  }
 0x2df   : > { %823 = vst [vmem:[#allocation2 + $0x60] sm:$0xff] %v807_v45  ;;  %v808_v49 = vadd.f32 %v783_v48, %v623_v44  ;;  %v855_v20 = vmax.f32 (!%p1177_p5), %v839_v16, 0.0  ;;  %v842_v27 = vld [vmem:[#allocation2 + $0x58] sm:$0xff] (!%p1177_p5)  ;;  %1260 = vst [vmem:[%s2228_s11 + $0x10] sm:$0xff] (!%p1177_p5), %v1232_v31  }
 0x2e0   : > { %826 = vst [vmem:[#allocation2 + $0x78] sm:$0xff] %v810_v47  ;;  %v840_v17 = vld [vmem:[#allocation2 + $0x48] sm:$0xff] (!%p1177_p5)  ;;  %v858_v34 = vmax.f32 (!%p1177_p5), %v842_v27, 0.0  ;;  %v889_v39 = vmul.f32 (!%p1177_p5), %v873_v29, %v857_v28 }
 0x2e1   : > { %824 = vst [vmem:[#allocation2 + $0x68] sm:$0xff] %v808_v49  ;;  %v856_v21 = vmax.f32 (!%p1177_p5), %v840_v17, 0.0  ;;  %v887_v32 = vmul.f32 (!%p1177_p5), %v871_v22, %v855_v20  ;;  %v877_v49 = vld [vmem:[%s2221_s14 + $0x70] sm:$0xff] (!%p1177_p5) }
 0x2e2   : > { %v890_v46 = vmul.f32 %v874_v30, %v858_v34 }
 0x2e3   : > { %v888_v33 = vmul.f32 %v872_v23, %v856_v21 }
 0x2e4   : > { %v1247_v53 = vpack.c.bf16 %v890_v46, %v889_v39 }
 0x2e5   : > { %v845_v43 = vld [vmem:[#allocation2 + $0x70] sm:$0xff]  ;;  %v1242_v45 = vpack.c.bf16 %v888_v33, %v887_v32 }
 0x2e6   : > { %v843_v35 = vld [vmem:[#allocation2 + $0x60] sm:$0xff]  ;;  %v861_v47 = vmax.f32 %v845_v43, 0.0  ;;  %1263 = vst [vmem:[%s2228_s11 + $0x28] sm:$0xff] %v1247_v53  }
 0x2e7   : > { %v859_v40 = vmax.f32 %v843_v35, 0.0  ;;  %v846_v44 = vld [vmem:[#allocation2 + $0x78] sm:$0xff]  ;;  %1262 = vst [vmem:[%s2228_s11 + $0x20] sm:$0xff] %v1242_v45  }
 0x2e8   : > { %v844_v36 = vld [vmem:[#allocation2 + $0x68] sm:$0xff]  ;;  %v862_v48 = vmax.f32 %v846_v44, 0.0  ;;  %v893_v54 = vmul.f32 %v877_v49, %v861_v47 }
 0x2e9   : > { %v860_v41 = vmax.f32 %v844_v36, 0.0  ;;  %v891_v51 = vmul.f32 %v875_v37, %v859_v40 }
 0x2ea   : > { %v894_v55 = vmul.f32 %v878_v50, %v862_v48 }
 0x2eb   : > { %v892_v52 = vmul.f32 %v876_v42, %v860_v41 }
 0x2ec   : > { %v1257_v57 = vpack.c.bf16 %v894_v55, %v893_v54 }
 0x2ed   : > { %v1252_v56 = vpack.c.bf16 %v892_v52, %v891_v51 }
 0x2ee   : > { %1265 = vst [vmem:[%s2228_s11 + $0x38] sm:$0xff] %v1257_v57  }
 0x2ef   : > { %1264 = vst [vmem:[%s2228_s11 + $0x30] sm:$0xff] %v1252_v56  }
 0x2f0 PF: > { %s2432_s28 = sld [smem:[#allocation19_spill]]  ;;  %s2433_s8 = sld [smem:[#allocation28_spill]] }
 0x2f1   : > { %s989_s3 = sshll.u32 %s2228_s11, 4  ;;  %s976_s0 = scalar_lea.sflag [#allocation5], %s2217_s1  ;;  %s2282_s3 = int_to_ptr.vmem [resolvable:$true] %s989_s3 }
 0x2f2   : > { %s1658_s14 = scalar_lea.vmem %s2282_s3, 1024  ;;  %p2434_p9 = scmp.ne.s32.totalorder %s2417_s13, 0 }
 0x2f3   : > { %p1659_p3 = scmp.ne.s32.totalorder %s2282_s3, %s1658_s14  ;;  %s1827_s5 = smov [#allocation11]  }
 0x2f4   : > { %s1662_s7 = sshll.u32 %s1827_s5, 4  ;;  %s1663_s7 = int_to_ptr.vmem [resolvable:$false] %s1662_s7 }
 0x2f5   : > { %p1660_p13 = pnand %p1659_p3, %p2434_p9  ;;  %s1664_s24 = scalar_lea.vmem %s1663_s7, 2048 }
 0x2f6   : > { %s1218_s21 = sshll.u32 %s2432_s28, 10  ;;  %p1665_p2 = scmp.lt.s32.totalorder %s2282_s3, %s1663_s7 }
 0x2f7   : > { %s2279_s12 = scalar_lea.hbm %s2433_s8, %s1218_s21  ;;  %p1661_p8 = pneg %p1660_p13 }
 0x2f8   : > { %p1666_p11 = scmp.lt.s32.totalorder %s1664_s24, %s1658_s14 }
 0x2fa   : > { %p1667_p1 = por %p1666_p11, %p1665_p2 }
 0x2fc   : > { %p1668_p4 = pnand %p1667_p1, %p1661_p8 }
 0x2fe   : > { %1671 = shalt.err (!%p1668_p4)
}
 0x2ff   : > { %s1672_s11 = scalar_lea.hbm %s2279_s12, 1024  ;;  %s1676_s25 = scalar_lea.hbm %s2433_s8, 2048 }
 0x300   : > { %p1673_p0 = scmp.ne.s32.totalorder %s2279_s12, %s1672_s11  ;;  %p1677_p12 = scmp.lt.u32.totalorder %s2279_s12, %s2433_s8 }
 0x301   : > { %p1678_p6 = scmp.lt.u32.totalorder %s1676_s25, %s1672_s11  ;;  %p1680_p3 = scmp.lt.u32.totalorder %s1672_s11, %s2279_s12 }
 0x302   : > { %p1674_p7 = pnand %p1673_p0, %p2434_p9 }
 0x303   : > { %p1679_p5 = por %p1678_p6, %p1677_p12 }
 0x304   : > { %p1675_p10 = pneg %p1674_p7 }
 0x305   : > { %p1681_p13 = por %p1680_p3, %p1679_p5 }
 0x307   : > { %p1682_p8 = pnand %p1681_p13, %p1675_p10 }
 0x309   : > { %1685 = shalt.err (!%p1682_p8)
}
 0x30a   : > { %s1828_s17 = smov 64   ;;  %s1829_s9 = smov 4  }
 0x30b   : > { %1372 = dma.vmem_to_hbm [thread:$0]  (%p2434_p9), %s2282_s3, 1024, %s2279_s12, %s976_s0, %s1828_s17, %s1828_s17, %s1829_s9  }
 0x30c PF: > { %p1395_p2 = scmp.ge.s32.totalorder %s1816_s6, 2  ;;  %s1004_s14 = sand.u32 1, %s1764_s18  }
 0x30d   : > { %p2435_p11 = scmp.ne.s32.totalorder %s2418_s16, 0  ;;  %s1005_s5 = scalar_lea.sflag [#allocation5], %s1004_s14 }
 0x30f   : > { %p1389_p1 = pnand %p1395_p2, %p2435_p11 }
 0x311   : > { %1759 = dma.done.wait (!%p1389_p1), %s1005_s5, 1024  }
 0x312   : > { %1761 = vsyncadd (!%p1389_p1), %s1005_s5, 4294966272  ;;  %s27_s6 = sadd.s32 1, %s1816_s6   ;;  %s2437_s24 = sld [smem:[#allocation17_spill]] }
 0x313   : > { %p2313_p4 = scmp.ge.s32.totalorder %s27_s6, 6   ;;  %s2438_s13 = sld [smem:[#allocation23_spill]] }
 0x314   : > { %s2439_s16 = sld [smem:[#allocation20_spill]]  ;;  %s2440_s1 = sld [smem:[#allocation21_spill]] }
 0x315   : > { %s2441_s18 = smov %s1768_s19  ;;  %s2442_s19 = smov %s1772_s20 }
 0x316   : > { %s2443_s20 = smov %s2130_s10  ;;  %s2444_s21 = smov %s1780_s22 }
 0x317   : > { %s2445_s22 = smov %s1784_s23  ;;  %s2446_s23 = smov %s2061_s27 }
 0x318   : > { %s2447_s25 = smov %s1796_s26  ;;  %s2449_s27 = smov %s1808_s29 }
 0x319   : > { %s2448_s26 = smov %s2438_s13  ;;  %s2450_s28 = smov %s1812_s30 }
 0x31a   : > { %s2451_s29 = smov %s2439_s16  ;;  %s2452_s30 = smov %s2440_s1 }
 0x31b   :  { %26 = sbr.rel (!%p2313_p4) target bundleno = 20 (0x14), region = 123 }
 0x322   :  { %1010 = vsyncpa [#allocation4], 1 }
 0x323   :  { %1012 = vsyncpa [#allocation4 + $0x1], 1 }
 0x324   :  { %1013 = vsyncpa [#allocation7], 1 }
 0x325   :  { %1015 = vsyncpa [#allocation7 + $0x1], 1 }
 0x326   :  { %1016 = vsyncpa [#allocation10], 1 }
 0x327   :  { %1018 = vsyncpa [#allocation10 + $0x1], 1 }
 0x328   :  { %1019 = vsyncpa [#allocation5], 1 }
 0x329   :  { %1021 = vsyncpa [#allocation5 + $0x1], 1 }

</bundles_post_ra>
